<compile_context>
chip_gen: v6e
topology: v6e:2x2x1
jax: 0.10.0
libtpu: 0.0.40
codegen_flags: <defaults>
</compile_context>

<pallas_src>
from typing import NamedTuple

import jax
import jax.numpy as jnp
from jax.experimental import pallas as pl
from jax.experimental.pallas import tpu as pltpu

_LANE = 128           # vreg lane width
_SUBLANE_F32 = 8      # f32 sublane packing
_SUBLANE_BF16 = 16    # bf16 sublane packing (2 rows / sublane)
_OUT_LANES = 128      # lane-dense output block width
_MIB = 1024 * 1024


def _round_up(x, m):
    return (x + m - 1) // m * m


def _cdiv(a, b):
    return -(-a // b)


def _device_kind():
    try:
        return jax.devices()[0].device_kind.lower()
    except Exception:
        return ""


def _is_megacore():
    """v7x has 2 TensorCores per chip; v5e/v6e have 1 (serial grid)."""
    kind = _device_kind()
    return ("v7" in kind) or ("7x" in kind)


def _default_compute_dtype():
    """bf16 MXU feed on v6e/v7x (f32 accumulation kept); exact f32 elsewhere."""
    kind = _device_kind()
    if ("v6" in kind) or ("trillium" in kind) or ("v7" in kind) or ("7x" in kind):
        return jnp.bfloat16
    return jnp.float32


def _vmem_budget_bytes():
    """Usable VMEM per TensorCore, with headroom for compiler scratch."""
    try:
        vmem = int(pltpu.get_tpu_info().vmem_capacity_bytes)
    except Exception:
        vmem = 64 * _MIB                      # conservative (v7x per-TC)
    return max(16 * _MIB, min(vmem - 8 * _MIB, int(vmem * 0.875)))


class LinearNetParams(NamedTuple):
    w1: jax.Array       # (n_input, H) compute_dtype, zero-padded hidden cols
    w2: jax.Array       # (H, H) compute_dtype, zero-padded rows/cols
    fused: jax.Array    # (8, H) f32; row 0 = b1, row 1 = b2, row 2 = fc3 weight
    n_input: int
    n_hidden: int


def prepare_params(w1, b1, w2, b2, w3, *, compute_dtype=None):
    """Pad / cast the weights ONCE (model-load time) -- off the forward hot path.

    w1: [n_input, n_hidden] (pre-transposed), b1: [n_hidden]
    w2: [n_hidden, n_hidden],                 b2: [n_hidden]
    w3: [n_hidden, 1] (fc3 weight, pre-transposed, no bias)
    """
    if compute_dtype is None:
        compute_dtype = _default_compute_dtype()
    n_input, n_hidden = w1.shape
    H = _round_up(n_hidden, _LANE)
    cd = compute_dtype
    # Cast before padding: zero padding is exact (relu(0 + 0) = 0; zero rows/cols
    # contribute nothing) and no full f32 HxH temp is created for bf16.
    w1p = jnp.zeros((n_input, H), cd).at[:, :n_hidden].set(w1.astype(cd))
    w2p = jnp.zeros((H, H), cd).at[:n_hidden, :n_hidden].set(w2.astype(cd))
    fused = (
        jnp.zeros((_SUBLANE_F32, H), jnp.float32)
        .at[0, :n_hidden].set(b1.reshape(-1).astype(jnp.float32))
        .at[1, :n_hidden].set(b2.reshape(-1).astype(jnp.float32))
        .at[2, :n_hidden].set(w3.reshape(-1).astype(jnp.float32))
    )
    return LinearNetParams(w1p, w2p, fused, int(n_input), int(n_hidden))


def _mlp_kernel(x_ref, w1_ref, w2_ref, p_ref, o_ref):
    p = p_ref[...]                      # (8, H) f32: b1 / b2 / w3 rows
    # fc1 -> relu (MXU matmul, f32 accumulation; bias add + relu on VPU in f32)
    h1 = jnp.dot(x_ref[...], w1_ref[...], preferred_element_type=jnp.float32)
    h1 = jnp.maximum(h1 + p[0:1, :], 0.0)
    # dropout1: identity in eval mode
    # fc2 -> relu
    h2 = jnp.dot(h1.astype(w2_ref.dtype), w2_ref[...],
                 preferred_element_type=jnp.float32)
    h2 = jnp.maximum(h2 + p[1:2, :], 0.0)
    # dropout2: identity in eval mode
    # fc3 (no bias), N=1: VPU multiply + XLU lane reduction instead of an MXU pass.
    y = jnp.sum(h2 * p[2:3, :], axis=-1, keepdims=True)
    # Lane-dense store: broadcast the single output column across 128 lanes;
    # the wrapper slices column 0 back out.
    o_ref[...] = jnp.broadcast_to(y, o_ref.shape).astype(o_ref.dtype)


def _choose_block_b(B, n_input, H, itemsize, row_align, megacore, budget):
    """Batch tile sized from the real VMEM working set; generation-aware split."""
    # Single-buffered weights + fused f32 params.
    weight_bytes = (n_input * H + H * H) * itemsize + _SUBLANE_F32 * H * 4
    # Per batch row: double-buffered x tile + double-buffered f32 output tile.
    per_row = 2 * (n_input * itemsize + _OUT_LANES * 4)
    avail = budget - weight_bytes - 2 * _MIB
    if avail <= per_row * row_align:
        max_rows = row_align
    else:
        max_rows = (avail // per_row) // row_align * row_align
    b_aligned = _round_up(max(B, 1), row_align)

    if (not megacore) or b_aligned <= row_align:
        # Serial grid (v5e/v6e single TC) or tiny batch: one (largest feasible)
        # tile -- splitting would only add ~0.35us/step overhead.
        block_b = min(b_aligned, max_rows)
    else:
        # v7x: >=2 tiles so both TensorCores get work; keep the tile count even.
        block_b = min(_round_up(_cdiv(b_aligned, 2), row_align), max_rows)
        tiles = _cdiv(b_aligned, block_b)
        if tiles > 1 and tiles % 2 == 1:
            block_b = _round_up(_cdiv(b_aligned, tiles + 1), row_align)
    return max(row_align, int(block_b)), weight_bytes


def _build_call(block_b, B_pad, n_input, H, vmem_limit, single_buffer_weights):
    pipeline_mode = pl.Buffered(1) if single_buffer_weights else None

    def wspec(shape):
        # Grid-invariant operands: constant index_map; single-buffer when possible.
        if pipeline_mode is None:
            return pl.BlockSpec(shape, lambda i: (0, 0))
        return pl.BlockSpec(shape, lambda i: (0, 0), pipeline_mode=pipeline_mode)

    return pl.pallas_call(
        _mlp_kernel,
        out_shape=jax.ShapeDtypeStruct((B_pad, _OUT_LANES), jnp.float32),
        grid_spec=pltpu.PrefetchScalarGridSpec(
            num_scalar_prefetch=0,
            grid=(B_pad // block_b,),
            in_specs=[
                pl.BlockSpec((block_b, n_input), lambda i: (i, 0)),  # x (pipelined over batch)
                wspec((n_input, H)),                                 # W1 (grid-invariant)
                wspec((H, H)),                                       # W2 (grid-invariant)
                wspec((_SUBLANE_F32, H)),                            # fused b1 / b2 / w3
            ],
            out_specs=pl.BlockSpec((block_b, _OUT_LANES), lambda i: (i, 0)),
        ),
        compiler_params=pltpu.CompilerParams(
            dimension_semantics=("parallel",),   # batch tiles -> both TCs on v7x
            vmem_limit_bytes=int(vmem_limit),
        ),
    )


# Memoized: does this jax build accept single-buffered (Buffered(1)) weight specs?
_WEIGHT_SINGLE_BUFFER_OK = None


def linear_net_forward(x, params: LinearNetParams, *, block_b=None):
    """Eval-mode LinearNet forward.  x: [B, n_input] f32  ->  [B, 1] f32."""
    global _WEIGHT_SINGLE_BUFFER_OK
    B, n_input = x.shape
    assert n_input == params.n_input, (n_input, params.n_input)
    H = params.w1.shape[1]
    cd = params.w1.dtype
    itemsize = jnp.dtype(cd).itemsize
    row_align = _SUBLANE_BF16 if cd == jnp.bfloat16 else _SUBLANE_F32

    budget = _vmem_budget_bytes()
    auto_block_b, weight_bytes = _choose_block_b(
        B, n_input, H, itemsize, row_align, _is_megacore(), budget)
    if block_b is None:
        block_b = auto_block_b
    block_b = _round_up(int(block_b), row_align)
    B_pad = _round_up(B, block_b)

    # VMEM limit derived from the actual working set (single-buffered weights,
    # double-buffered activation / output tiles), with slack, capped at budget.
    needed = (weight_bytes
              + 2 * block_b * n_input * itemsize
              + 2 * block_b * _OUT_LANES * 4)
    vmem_limit = min(budget, max(2 * needed, 16 * _MIB))

    # Batch-only zero padding (no lane padding of x; padded rows are sliced off).
    if B_pad != B or x.dtype != cd:
        xp = jnp.zeros((B_pad, n_input), cd).at[:B].set(x.astype(cd))
    else:
        xp = x

    if _WEIGHT_SINGLE_BUFFER_OK is None:
        modes = (True, False)
    else:
        modes = (_WEIGHT_SINGLE_BUFFER_OK,)

    last_err = None
    for single_buf in modes:
        try:
            fn = _build_call(block_b, B_pad, n_input, H, vmem_limit, single_buf)
            out_padded = jax.block_until_ready(
                fn(xp, params.w1, params.w2, params.fused))
            _WEIGHT_SINGLE_BUFFER_OK = single_buf
            # Layout plumbing only: drop batch padding and the broadcast lanes.
            return out_padded[:B, :1]
        except Exception as e:   # fallback if Buffered(1) is rejected by this build
            last_err = e
    raise last_err


def _ref_forward(x, w1, b1, w2, b2, w3):
    h1 = jnp.maximum(x @ w1 + b1.reshape(1, -1), 0.0)
    h2 = jnp.maximum(h1 @ w2 + b2.reshape(1, -1), 0.0)
    return h2 @ w3.reshape(-1, 1)


if __name__ == "__main__":
    # Small shapes consistent with the module: n_input=32, n_hidden=32.
    # B=12 exercises batch padding and (on v7x) a 2-tile parallel grid.
    B, n_input, n_hidden = 12, 32, 32

    key = jax.random.PRNGKey(0)
    kx, k1, kb1, k2, kb2, k3 = jax.random.split(key, 6)

    x = jax.random.normal(kx, (B, n_input), dtype=jnp.float32)

    def init_w(k, fan_in, fan_out):
        bound = 1.0 / jnp.sqrt(jnp.float32(fan_in))
        return jax.random.uniform(k, (fan_in, fan_out), jnp.float32, -bound, bound)

    w1 = init_w(k1, n_input, n_hidden)
    b1 = jax.random.uniform(kb1, (n_hidden,), jnp.float32,
                            -1.0 / jnp.sqrt(jnp.float32(n_input)),
                            1.0 / jnp.sqrt(jnp.float32(n_input)))
    w2 = init_w(k2, n_hidden, n_hidden)
    b2 = jax.random.uniform(kb2, (n_hidden,), jnp.float32,
                            -1.0 / jnp.sqrt(jnp.float32(n_hidden)),
                            1.0 / jnp.sqrt(jnp.float32(n_hidden)))
    w3 = init_w(k3, n_hidden, 1)  # fc3 has no bias

    ref = _ref_forward(x, w1, b1, w2, b2, w3)

    # Exact f32 path (bit-compatible semantics of the original eval-mode module).
    params_f32 = prepare_params(w1, b1, w2, b2, w3, compute_dtype=jnp.float32)
    out = jax.block_until_ready(linear_net_forward(x, params_f32))
    assert out.shape == (B, 1), out.shape
    assert jnp.allclose(out, ref, atol=1e-5, rtol=1e-5), "f32 kernel mismatch vs reference"

    # bf16 MXU-feed path (default selection on v6e/v7x); f32 accumulation,
    # intentionally an approximation -> looser tolerance.
    params_bf16 = prepare_params(w1, b1, w2, b2, w3, compute_dtype=jnp.bfloat16)
    out_bf16 = jax.block_until_ready(linear_net_forward(x, params_bf16))
    assert out_bf16.shape == (B, 1), out_bf16.shape
    assert jnp.allclose(out_bf16, ref, atol=5e-2, rtol=5e-2), "bf16 kernel mismatch vs reference"

    print("KERNEL_OK")
</pallas_src>

<mosaic_0001>
module attributes {stable_mosaic.version = 11 : i64} {
  func.func @_mlp_kernel(%arg0: i32, %arg1: memref<16x32xf32, #tpu.memory_space<vmem>>, %arg2: memref<32x128xf32, #tpu.memory_space<vmem>>, %arg3: memref<128x128xf32, #tpu.memory_space<vmem>>, %arg4: memref<8x128xf32, #tpu.memory_space<vmem>>, %arg5: memref<16x128xf32, #tpu.memory_space<vmem>>) attributes {dimension_semantics = [#tpu.dimension_semantics<parallel>], iteration_bounds = array<i64: 1>, scalar_prefetch = 0 : i64, scratch_operands = 0 : i64, tpu.core_type = #tpu.core_type<tc>, window_params = [{transform_indices = @transform_0, window_bounds = array<i64: 16, 32>}, {pipeline_mode = #tpu.pipeline_mode<synchronous>, transform_indices = @transform_1, window_bounds = array<i64: 32, 128>}, {pipeline_mode = #tpu.pipeline_mode<synchronous>, transform_indices = @transform_2, window_bounds = array<i64: 128, 128>}, {pipeline_mode = #tpu.pipeline_mode<synchronous>, transform_indices = @transform_3, window_bounds = array<i64: 8, 128>}, {transform_indices = @transform_4, window_bounds = array<i64: 16, 128>}]} {
    %c0 = arith.constant 0 : index
    %c0_0 = arith.constant 0 : index
    %0 = vector.load %arg4[%c0, %c0_0] : memref<8x128xf32, #tpu.memory_space<vmem>>, vector<8x128xf32>
    %c0_1 = arith.constant 0 : index
    %c0_2 = arith.constant 0 : index
    %1 = vector.load %arg1[%c0_1, %c0_2] : memref<16x32xf32, #tpu.memory_space<vmem>>, vector<16x32xf32>
    %c0_3 = arith.constant 0 : index
    %c0_4 = arith.constant 0 : index
    %2 = vector.load %arg2[%c0_3, %c0_4] : memref<32x128xf32, #tpu.memory_space<vmem>>, vector<32x128xf32>
    %cst = arith.constant dense<0.000000e+00> : vector<16x128xf32>
    %3 = tpu.matmul %1, %2, %cst {dimension_numbers = #tpu.dot_dimension_numbers<[1], [0], [0], [1], [0, 0, 1, 1], [], []>} : vector<16x32xf32>, vector<32x128xf32>, vector<16x128xf32> -> vector<16x128xf32>
    %4 = vector.extract_strided_slice %0 {offsets = [0, 0], sizes = [1, 128], strides = [1, 1]} : vector<8x128xf32> to vector<1x128xf32>
    %5 = vector.broadcast %4 : vector<1x128xf32> to vector<16x128xf32>
    %6 = arith.addf %3, %5 : vector<16x128xf32>
    %cst_5 = arith.constant 0.000000e+00 : f32
    %7 = vector.broadcast %cst_5 : f32 to vector<16x128xf32>
    %8 = arith.maximumf %6, %7 : vector<16x128xf32>
    %c0_6 = arith.constant 0 : index
    %c0_7 = arith.constant 0 : index
    %9 = vector.load %arg3[%c0_6, %c0_7] : memref<128x128xf32, #tpu.memory_space<vmem>>, vector<128x128xf32>
    %cst_8 = arith.constant dense<0.000000e+00> : vector<16x128xf32>
    %10 = tpu.matmul %8, %9, %cst_8 {dimension_numbers = #tpu.dot_dimension_numbers<[1], [0], [0], [1], [0, 0, 1, 1], [], []>} : vector<16x128xf32>, vector<128x128xf32>, vector<16x128xf32> -> vector<16x128xf32>
    %11 = vector.extract_strided_slice %0 {offsets = [1, 0], sizes = [1, 128], strides = [1, 1]} : vector<8x128xf32> to vector<1x128xf32>
    %12 = vector.broadcast %11 : vector<1x128xf32> to vector<16x128xf32>
    %13 = arith.addf %10, %12 : vector<16x128xf32>
    %cst_9 = arith.constant 0.000000e+00 : f32
    %14 = vector.broadcast %cst_9 : f32 to vector<16x128xf32>
    %15 = arith.maximumf %13, %14 : vector<16x128xf32>
    %16 = vector.extract_strided_slice %0 {offsets = [2, 0], sizes = [1, 128], strides = [1, 1]} : vector<8x128xf32> to vector<1x128xf32>
    %17 = vector.broadcast %16 : vector<1x128xf32> to vector<16x128xf32>
    %18 = arith.mulf %15, %17 : vector<16x128xf32>
    %cst_10 = arith.constant dense<0.000000e+00> : vector<16xf32>
    %19 = vector.multi_reduction <add>, %18, %cst_10 [1] : vector<16x128xf32> to vector<16xf32>
    %20 = vector.shape_cast %19 : vector<16xf32> to vector<16x1xf32>
    %21 = vector.shape_cast %20 : vector<16x1xf32> to vector<16x1xf32>
    %22 = vector.broadcast %21 : vector<16x1xf32> to vector<16x128xf32>
    %c0_11 = arith.constant 0 : index
    %c0_12 = arith.constant 0 : index
    %23 = vector.load %arg5[%c0_11, %c0_12] : memref<16x128xf32, #tpu.memory_space<vmem>>, vector<16x128xf32>
    tpu.vector_store %arg5[%c0_11, %c0_12], %22 {strides = array<i32>} : memref<16x128xf32, #tpu.memory_space<vmem>>, vector<16x128xf32>,
    return
  }
  func.func @transform_0(%arg0: i32) -> (i32, i32) {
    %c0_i32 = arith.constant 0 : i32
    %c0_i32_0 = arith.constant 0 : i32
    return %arg0, %c0_i32 : i32, i32
  }
  func.func @transform_1(%arg0: i32) -> (i32, i32) {
    %c0_i32 = arith.constant 0 : i32
    %c0_i32_0 = arith.constant 0 : i32
    %c0_i32_1 = arith.constant 0 : i32
    return %c0_i32, %c0_i32_0 : i32, i32
  }
  func.func @transform_2(%arg0: i32) -> (i32, i32) {
    %c0_i32 = arith.constant 0 : i32
    %c0_i32_0 = arith.constant 0 : i32
    %c0_i32_1 = arith.constant 0 : i32
    return %c0_i32, %c0_i32_0 : i32, i32
  }
  func.func @transform_3(%arg0: i32) -> (i32, i32) {
    %c0_i32 = arith.constant 0 : i32
    %c0_i32_0 = arith.constant 0 : i32
    %c0_i32_1 = arith.constant 0 : i32
    return %c0_i32, %c0_i32_0 : i32, i32
  }
  func.func @transform_4(%arg0: i32) -> (i32, i32) {
    %c0_i32 = arith.constant 0 : i32
    %c0_i32_0 = arith.constant 0 : i32
    return %arg0, %c0_i32 : i32, i32
  }
}

module attributes {stable_mosaic.version = 11 : i64} {
  func.func @_mlp_kernel(%arg0: i32, %arg1: memref<16x32xf32, #tpu.memory_space<vmem>>, %arg2: memref<32x128xf32, #tpu.memory_space<vmem>>, %arg3: memref<128x128xf32, #tpu.memory_space<vmem>>, %arg4: memref<8x128xf32, #tpu.memory_space<vmem>>, %arg5: memref<16x128xf32, #tpu.memory_space<vmem>>) attributes {dimension_semantics = [#tpu.dimension_semantics<parallel>], iteration_bounds = array<i64: 1>, scalar_prefetch = 0 : i64, scratch_operands = 0 : i64, tpu.core_type = #tpu.core_type<tc>, window_params = [{transform_indices = @transform_0, window_bounds = array<i64: 16, 32>}, {pipeline_mode = #tpu.pipeline_mode<synchronous>, transform_indices = @transform_1, window_bounds = array<i64: 32, 128>}, {pipeline_mode = #tpu.pipeline_mode<synchronous>, transform_indices = @transform_2, window_bounds = array<i64: 128, 128>}, {pipeline_mode = #tpu.pipeline_mode<synchronous>, transform_indices = @transform_3, window_bounds = array<i64: 8, 128>}, {transform_indices = @transform_4, window_bounds = array<i64: 16, 128>}]} {
    %c0 = arith.constant 0 : index
    %c0_0 = arith.constant 0 : index
    %0 = vector.load %arg4[%c0, %c0_0] : memref<8x128xf32, #tpu.memory_space<vmem>>, vector<8x128xf32>
    %c0_1 = arith.constant 0 : index
    %c0_2 = arith.constant 0 : index
    %1 = vector.load %arg1[%c0_1, %c0_2] : memref<16x32xf32, #tpu.memory_space<vmem>>, vector<16x32xf32>
    %c0_3 = arith.constant 0 : index
    %c0_4 = arith.constant 0 : index
    %2 = vector.load %arg2[%c0_3, %c0_4] : memref<32x128xf32, #tpu.memory_space<vmem>>, vector<32x128xf32>
    %cst = arith.constant dense<0.000000e+00> : vector<16x128xf32>
    %3 = tpu.matmul %1, %2, %cst {dimension_numbers = #tpu.dot_dimension_numbers<[1], [0], [0], [1], [0, 0, 1, 1], [], []>} : vector<16x32xf32>, vector<32x128xf32>, vector<16x128xf32> -> vector<16x128xf32>
    %4 = vector.extract_strided_slice %0 {offsets = [0, 0], sizes = [1, 128], strides = [1, 1]} : vector<8x128xf32> to vector<1x128xf32>
    %5 = vector.broadcast %4 : vector<1x128xf32> to vector<16x128xf32>
    %6 = arith.addf %3, %5 : vector<16x128xf32>
    %cst_5 = arith.constant 0.000000e+00 : f32
    %7 = vector.broadcast %cst_5 : f32 to vector<16x128xf32>
    %8 = arith.maximumf %6, %7 : vector<16x128xf32>
    %c0_6 = arith.constant 0 : index
    %c0_7 = arith.constant 0 : index
    %9 = vector.load %arg3[%c0_6, %c0_7] : memref<128x128xf32, #tpu.memory_space<vmem>>, vector<128x128xf32>
    %cst_8 = arith.constant dense<0.000000e+00> : vector<16x128xf32>
    %10 = tpu.matmul %8, %9, %cst_8 {dimension_numbers = #tpu.dot_dimension_numbers<[1], [0], [0], [1], [0, 0, 1, 1], [], []>} : vector<16x128xf32>, vector<128x128xf32>, vector<16x128xf32> -> vector<16x128xf32>
    %11 = vector.extract_strided_slice %0 {offsets = [1, 0], sizes = [1, 128], strides = [1, 1]} : vector<8x128xf32> to vector<1x128xf32>
    %12 = vector.broadcast %11 : vector<1x128xf32> to vector<16x128xf32>
    %13 = arith.addf %10, %12 : vector<16x128xf32>
    %cst_9 = arith.constant 0.000000e+00 : f32
    %14 = vector.broadcast %cst_9 : f32 to vector<16x128xf32>
    %15 = arith.maximumf %13, %14 : vector<16x128xf32>
    %16 = vector.extract_strided_slice %0 {offsets = [2, 0], sizes = [1, 128], strides = [1, 1]} : vector<8x128xf32> to vector<1x128xf32>
    %17 = vector.broadcast %16 : vector<1x128xf32> to vector<16x128xf32>
    %18 = arith.mulf %15, %17 : vector<16x128xf32>
    %cst_10 = arith.constant dense<0.000000e+00> : vector<16xf32>
    %19 = vector.multi_reduction <add>, %18, %cst_10 [1] : vector<16x128xf32> to vector<16xf32>
    %20 = vector.shape_cast %19 : vector<16xf32> to vector<16x1xf32>
    %21 = vector.shape_cast %20 : vector<16x1xf32> to vector<16x1xf32>
    %22 = vector.broadcast %21 : vector<16x1xf32> to vector<16x128xf32>
    %c0_11 = arith.constant 0 : index
    %c0_12 = arith.constant 0 : index
    %23 = vector.load %arg5[%c0_11, %c0_12] : memref<16x128xf32, #tpu.memory_space<vmem>>, vector<16x128xf32>
    tpu.vector_store %arg5[%c0_11, %c0_12], %22 {strides = array<i32>} : memref<16x128xf32, #tpu.memory_space<vmem>>, vector<16x128xf32>,
    return
  }
  func.func @transform_0(%arg0: i32) -> (i32, i32) {
    %c0_i32 = arith.constant 0 : i32
    %c0_i32_0 = arith.constant 0 : i32
    return %arg0, %c0_i32 : i32, i32
  }
  func.func @transform_1(%arg0: i32) -> (i32, i32) {
    %c0_i32 = arith.constant 0 : i32
    %c0_i32_0 = arith.constant 0 : i32
    %c0_i32_1 = arith.constant 0 : i32
    return %c0_i32, %c0_i32_0 : i32, i32
  }
  func.func @transform_2(%arg0: i32) -> (i32, i32) {
    %c0_i32 = arith.constant 0 : i32
    %c0_i32_0 = arith.constant 0 : i32
    %c0_i32_1 = arith.constant 0 : i32
    return %c0_i32, %c0_i32_0 : i32, i32
  }
  func.func @transform_3(%arg0: i32) -> (i32, i32) {
    %c0_i32 = arith.constant 0 : i32
    %c0_i32_0 = arith.constant 0 : i32
    %c0_i32_1 = arith.constant 0 : i32
    return %c0_i32, %c0_i32_0 : i32, i32
  }
  func.func @transform_4(%arg0: i32) -> (i32, i32) {
    %c0_i32 = arith.constant 0 : i32
    %c0_i32_0 = arith.constant 0 : i32
    return %arg0, %c0_i32 : i32, i32
  }
}

</mosaic_0001>

<bundles_post_ra>
// kernel: tpu_custom_call.1
= control target key start
LH: loop header
LB: loop body
LE: loop exit
PB: predicated region body
PF: predicated region fallthrough
CT: control target
= control target key end

     0   :  { %9 = vsyncpa [#allocation3], 0  ;;  %s542_s0 = inlined_call_operand.hbm [shape: f32[16,32], index: 0, kind: input, shape index: {}]   ;;  %s543_s1 = inlined_call_operand.hbm [shape: f32[32,128], index: 1, kind: input, shape index: {}]   ;;  %s544_s2 = inlined_call_operand.hbm [shape: f32[128,128], index: 2, kind: input, shape index: {}]   ;;  %s545_s3 = inlined_call_operand.hbm [shape: f32[8,128], index: 3, kind: input, shape index: {}]   ;;  %s546_s4 = inlined_call_operand.hbm [shape: f32[16,128], index: 4, kind: output, shape index: {}]  }
   0x1   :  { %10 = vsyncpa [#allocation6], 0 }
   0x2   :  { %11 = vsyncpa [#allocation9], 0 }
   0x3   :  { %12 = vsyncpa [#allocation4], 0  ;;  %s481_s15 = smov [#allocation5]   ;;  %s482_s17 = smov [#allocation2]  }
   0x4   :  { %s30_s16 = sshll.u32 %s481_s15, 4  ;;  %s18_s18 = sshll.u32 %s482_s17, 4  ;;  %s31_s16 = int_to_ptr.vmem [resolvable:$true] %s30_s16  ;;  %s19_s18 = int_to_ptr.vmem [resolvable:$true] %s18_s18 }
   0x5   :  { %s381_s19 = scalar_lea.vmem %s31_s16, 512  ;;  %p386_p1 = scmp.lt.s32.totalorder %s31_s16, %s31_s16 }
   0x6   :  { %p382_p0 = scmp.ne.s32.totalorder %s31_s16, %s381_s19  ;;  %p387_p2 = scmp.lt.s32.totalorder %s381_s19, %s381_s19 }
   0x8   :  { %p388_p3 = por %p387_p2, %p386_p1 }
   0xa   :  { %p389_p4 = pnand %p388_p3, %p382_p0 }
   0xc   :  { %392 = shalt.err (!%p389_p4)
}
   0xd   :  { %s483_s20 = smov 128   ;;  %s484_s21 = smov 8  }
   0xe   :  { %36 = dma.hbm_to_vmem [thread:$0]  %s543_s1, 512, %s31_s16, [#allocation6], %s483_s20, %s483_s20, %s484_s21  }
   0xf   :  { %s401_s24 = scalar_lea.vmem %s19_s18, 256  ;;  %p406_p6 = scmp.lt.s32.totalorder %s19_s18, %s19_s18 }
  0x10   :  { %p402_p5 = scmp.ne.s32.totalorder %s19_s18, %s401_s24  ;;  %p407_p7 = scmp.lt.s32.totalorder %s401_s24, %s401_s24 }
  0x12   :  { %p408_p8 = por %p407_p7, %p406_p6 }
  0x14   :  { %p409_p9 = pnand %p408_p8, %p402_p5 }
  0x16   :  { %412 = shalt.err (!%p409_p9)
}
  0x17   :  { %24 = dma.hbm_to_vmem [thread:$0]  %s542_s0, 256, %s19_s18, [#allocation3], %s483_s20, %s483_s20, %s484_s21  }
  0x18   :  { %s485_s27 = smov [#allocation7]   ;;  %s486_s29 = smov [#allocation8]  }
  0x19   :  { %s42_s28 = sshll.u32 %s485_s27, 4  ;;  %s55_s30 = sshll.u32 %s486_s29, 4  ;;  %s43_s28 = int_to_ptr.vmem [resolvable:$true] %s42_s28  ;;  %s56_s30 = int_to_ptr.vmem [resolvable:$true] %s55_s30 }
  0x1a   :  { %s421_s1 = scalar_lea.vmem %s43_s28, 2048  ;;  %p426_p11 = scmp.lt.s32.totalorder %s43_s28, %s43_s28 }
  0x1b   :  { %p422_p10 = scmp.ne.s32.totalorder %s43_s28, %s421_s1  ;;  %p427_p12 = scmp.lt.s32.totalorder %s421_s1, %s421_s1 }
  0x1d   :  { %p428_p13 = por %p427_p12, %p426_p11 }
  0x1f   :  { %p429_p0 = pnand %p428_p13, %p422_p10 }
  0x21   :  { %432 = shalt.err (!%p429_p0)
}
  0x22   :  { %48 = dma.hbm_to_vmem [thread:$0]  %s544_s2, 2048, %s43_s28, [#allocation6], %s483_s20, %s483_s20, %s484_s21  }
  0x23   :  { %s441_s0 = scalar_lea.vmem %s56_s30, 128  ;;  %p446_p2 = scmp.lt.s32.totalorder %s56_s30, %s56_s30 }
  0x24   :  { %p442_p1 = scmp.ne.s32.totalorder %s56_s30, %s441_s0  ;;  %p447_p3 = scmp.lt.s32.totalorder %s441_s0, %s441_s0 }
  0x26   :  { %p448_p4 = por %p447_p3, %p446_p2 }
  0x28   :  { %p449_p5 = pnand %p448_p4, %p442_p1 }
  0x2a   :  { %452 = shalt.err (!%p449_p5)
}
  0x2b   :  { %58 = dma.hbm_to_vmem [thread:$0]  %s545_s3, 128, %s56_s30, [#allocation9]  }
  0x2c   :  { %473 = dma.done.wait [#allocation3], 256  }
  0x2d   :  { %474 = vsyncadd [#allocation3], 4294967040 }
  0x2e   :  { %475 = dma.done.wait [#allocation6], 2560  }
  0x2f   :  { %476 = vsyncadd [#allocation6], 4294964736 }
  0x30   :  { %477 = dma.done.wait [#allocation9], 128  }
  0x31   :  { %478 = vsyncadd [#allocation9], 4294967168  ;;  %vm82_vm0 = vcmask 261120   ;;  %v77_v0 = vld [vmem:[#allocation5 + $0x18] sm:$0xff]  ;;  %v76_v1 = vld [vmem:[#allocation5 + $0x10] sm:$0xff]  ;;  %v78_v22 = vlaneseq  ;;  %s487_s2 = smov [#allocation10]  }
  0x32   :  { %320 = vmatprep.subr.mxu0 %v77_v0  ;;  %v72_v2 = vld [vmem:[#allocation2] sm:$0xff]  ;;  %v75_v3 = vld [vmem:[#allocation5 + $0x8] sm:$0xff]  ;;  %v181_v4 = vld [vmem:[#allocation7 + $0x78] sm:$0xff]  ;;  %s280_s3 = sshll.u32 %s487_s2, 4  ;;  %s281_s3 = int_to_ptr.vmem [resolvable:$true] %s280_s3 }
  0x33   :  { %321 = vmatpush3.msra.mxu0 %v77_v0  ;;  %328 = vmatprep.mubr.msk.f32.mxu0 %vm82_vm0, %v72_v2  ;;  %v180_v5 = vld [vmem:[#allocation7 + $0x70] sm:$0xff]  ;;  %v74_v6 = vld [vmem:[#allocation5] sm:$0xff]  ;;  %v179_v7 = vld [vmem:[#allocation7 + $0x68] sm:$0xff]  ;;  %v79_v23 = vshrl.u32 %v78_v22, 7  ;;  %s453_s9 = scalar_lea.vmem %s281_s3, 256  ;;  %p458_p7 = scmp.lt.s32.totalorder %s281_s3, %s281_s3 }
  0x34   :  { %322 = vmatprep.subr.mxu0 %v76_v1  ;;  %331 = vmatprep.subr.mxu1 %v181_v4  ;;  %v73_v8 = vld [vmem:[#allocation2 + $0x8] sm:$0xff]  ;;  %v178_v9 = vld [vmem:[#allocation7 + $0x60] sm:$0xff]  ;;  %v176_v11 = vld [vmem:[#allocation7 + $0x50] sm:$0xff]  ;;  %p454_p6 = scmp.ne.s32.totalorder %s281_s3, %s453_s9  ;;  %p459_p8 = scmp.lt.s32.totalorder %s453_s9, %s453_s9 }
  0x35   :  { %323 = vmatpush3.msra.mxu0 %v76_v1  ;;  %332 = vmatpush3.msra.mxu1 %v181_v4  ;;  %v177_v10 = vld [vmem:[#allocation7 + $0x58] sm:$0xff]  ;;  %v175_v12 = vld [vmem:[#allocation7 + $0x48] sm:$0xff]  ;;  %v174_v13 = vld [vmem:[#allocation7 + $0x40] sm:$0xff]  ;;  %v80_v24 = vsub.s32 0, %v79_v23  ;;  %v184_v33 = vsub.s32 1, %v79_v23  ;;  %v265_v36 = vsub.s32 2, %v79_v23 }
  0x36   :  { %324 = vmatprep.subr.mxu0 %v75_v3  ;;  %333 = vmatprep.subr.mxu1 %v180_v5  ;;  %v173_v14 = vld [vmem:[#allocation7 + $0x38] sm:$0xff]  ;;  %v172_v15 = vld [vmem:[#allocation7 + $0x30] sm:$0xff]  ;;  %v171_v16 = vld [vmem:[#allocation7 + $0x28] sm:$0xff]  ;;  %p460_p9 = por %p459_p8, %p458_p7 }
  0x37   :  { %325 = vmatpush3.msra.mxu0 %v75_v3  ;;  %334 = vmatpush3.msra.mxu1 %v180_v5  ;;  %v170_v17 = vld [vmem:[#allocation7 + $0x20] sm:$0xff]  ;;  %v169_v18 = vld [vmem:[#allocation7 + $0x18] sm:$0xff]  ;;  %v168_v19 = vld [vmem:[#allocation7 + $0x10] sm:$0xff] }
  0x38   :  { %326 = vmatprep.subr.mxu0 %v74_v6  ;;  %335 = vmatprep.subr.mxu1 %v179_v7  ;;  %v167_v20 = vld [vmem:[#allocation7 + $0x8] sm:$0xff]  ;;  %v166_v21 = vld [vmem:[#allocation7] sm:$0xff]  ;;  %p461_p10 = pnand %p460_p9, %p454_p6 }
  0x39   :  { %327 = vmatpush3.msra.mxu0 %v74_v6  ;;  %336 = vmatpush3.msra.mxu1 %v179_v7  ;;  %v71_v25 = vld [vmem:[#allocation8] sm:$0xff] }
  0x3a   :  { %329 = vmatmul.mubr.msk.f32.vlgmr.msra.gmra.mxu0 %vm82_vm0, %v73_v8  ;;  %337 = vmatprep.subr.mxu1 %v178_v9  ;;  %v81_v26 = vrot.slane %v71_v25, %v80_v24  ;;  %v185_v34 = vrot.slane %v71_v25, %v184_v33  ;;  %v266_v41 = vrot.slane %v71_v25, %v265_v36 }
  0x3b   :  { %338 = vmatpush3.msra.mxu1 %v178_v9 }
  0x3c   :  { %339 = vmatprep.subr.mxu1 %v177_v10 }
  0x3d   :  { %340 = vmatpush3.msra.mxu1 %v177_v10 }
  0x3e   :  { %341 = vmatprep.subr.mxu1 %v176_v11 }
  0x3f   :  { %342 = vmatpush3.msra.mxu1 %v176_v11 }
  0x40   :  { %343 = vmatprep.subr.mxu1 %v175_v12 }
  0x41   :  { %344 = vmatpush3.msra.mxu1 %v175_v12 }
  0x42   :  { %345 = vmatprep.subr.mxu1 %v174_v13 }
  0x43   :  { %346 = vmatpush3.msra.mxu1 %v174_v13 }
  0x44   :  { %347 = vmatprep.subr.mxu1 %v173_v14 }
  0x45   :  { %348 = vmatpush3.msra.mxu1 %v173_v14 }
  0x46   :  { %349 = vmatprep.subr.mxu1 %v172_v15 }
  0x47   :  { %350 = vmatpush3.msra.mxu1 %v172_v15 }
  0x48   :  { %351 = vmatprep.subr.mxu1 %v171_v16 }
  0x49   :  { %352 = vmatpush3.msra.mxu1 %v171_v16 }
  0x4a   :  { %353 = vmatprep.subr.mxu1 %v170_v17 }
  0x4b   :  { %354 = vmatpush3.msra.mxu1 %v170_v17 }
  0x4c   :  { %355 = vmatprep.subr.mxu1 %v169_v18 }
  0x4d   :  { %356 = vmatpush3.msra.mxu1 %v169_v18 }
  0x4e   :  { %357 = vmatprep.subr.mxu1 %v168_v19 }
  0x4f   :  { %358 = vmatpush3.msra.mxu1 %v168_v19 }
  0x50   :  { %359 = vmatprep.subr.mxu1 %v167_v20 }
  0x51   :  { %360 = vmatpush3.msra.mxu1 %v167_v20 }
  0x52   :  { %361 = vmatprep.subr.mxu1 %v166_v21 }
  0x53   :  { %362 = vmatpush3.msra.mxu1 %v166_v21 }
  0xfa   :  { %v330_v27 = vpop.f32.mrf.mxu0 }
  0xfb   :  { %v161_v28 = vadd.f32 %v330_v27, %v81_v26 }
  0xfc   :  { %v155_v29 = vpop.f32.mrf.mxu0 }
  0xfd   :  { %v156_v30 = vadd.f32 %v155_v29, %v81_v26  ;;  %v165_v32 = vmax.f32 %v161_v28, 0.0 }
  0xff   :  { %v164_v31 = vmax.f32 %v156_v30, 0.0 }
 0x101   :  { %363 = vmatprep.mubr.f32.mxu1 %v164_v31 }
 0x102   :  { %364 = vmatmul.mubr.f32.vlgmr.msra.gmra.mxu1 %v165_v32 }
 0x1c2   :  { %v365_v35 = vpop.f32.mrf.mxu1 }
 0x1c3   :  { %v258_v38 = vadd.f32 %v365_v35, %v185_v34 }
 0x1c4   :  { %v252_v37 = vpop.f32.mrf.mxu1 }
 0x1c5   :  { %v253_v39 = vadd.f32 %v252_v37, %v185_v34  ;;  %v262_v42 = vmax.f32 %v258_v38, 0.0 }
 0x1c7   :  { %v261_v40 = vmax.f32 %v253_v39, 0.0  ;;  %v268_v44 = vmul.f32 %v266_v41, %v262_v42 }
 0x1c9   :  { %v267_v43 = vmul.f32 %v266_v41, %v261_v40 }
 0x1cb   :  { %269 = vadd.xlane.f32.xlu0 %v267_v43 }
 0x1cf   :  { %271 = vadd.xlane.f32.xlu0 %v268_v44 }
 0x254   :  { %v270_v45 = vpop.xlane.xlu0 %269 }
 0x255   :  { %273 = vst [vmem:[#allocation10] sm:$0xff] %v270_v45 }
 0x258   :  { %v272_v46 = vpop.xlane.xlu0 %271 }
 0x259   :  { %274 = vst [vmem:[#allocation10 + $0x8] sm:$0xff] %v272_v46 }
 0x25a   :  { %464 = shalt.err (!%p461_p10)
}
 0x25b   :  { %286 = dma.vmem_to_hbm [thread:$0]  %s281_s3, 256, %s546_s4, [#allocation4], %s483_s20, %s483_s20, %s484_s21  }
 0x25c   :  { %479 = dma.done.wait [#allocation4], 256  }
 0x25d   :  { %480 = vsyncadd [#allocation4], 4294967040 }
 0x25e   :  { %290 = vsyncpa [#allocation3], 1 }
 0x25f   :  { %291 = vsyncpa [#allocation6], 1 }
 0x260   :  { %292 = vsyncpa [#allocation9], 1 }
 0x261   :  { %293 = vsyncpa [#allocation4], 1 }

// kernel: tpu_custom_call.1
= control target key start
LH: loop header
LB: loop body
LE: loop exit
PB: predicated region body
PF: predicated region fallthrough
CT: control target
= control target key end

     0   :  { %9 = vsyncpa [#allocation3], 0  ;;  %s542_s0 = inlined_call_operand.hbm [shape: f32[16,32], index: 0, kind: input, shape index: {}]   ;;  %s543_s1 = inlined_call_operand.hbm [shape: f32[32,128], index: 1, kind: input, shape index: {}]   ;;  %s544_s2 = inlined_call_operand.hbm [shape: f32[128,128], index: 2, kind: input, shape index: {}]   ;;  %s545_s3 = inlined_call_operand.hbm [shape: f32[8,128], index: 3, kind: input, shape index: {}]   ;;  %s546_s4 = inlined_call_operand.hbm [shape: f32[16,128], index: 4, kind: output, shape index: {}]  }
   0x1   :  { %10 = vsyncpa [#allocation6], 0 }
   0x2   :  { %11 = vsyncpa [#allocation9], 0 }
   0x3   :  { %12 = vsyncpa [#allocation4], 0  ;;  %s481_s15 = smov [#allocation5]   ;;  %s482_s17 = smov [#allocation2]  }
   0x4   :  { %s30_s16 = sshll.u32 %s481_s15, 4  ;;  %s18_s18 = sshll.u32 %s482_s17, 4  ;;  %s31_s16 = int_to_ptr.vmem [resolvable:$true] %s30_s16  ;;  %s19_s18 = int_to_ptr.vmem [resolvable:$true] %s18_s18 }
   0x5   :  { %s381_s19 = scalar_lea.vmem %s31_s16, 512  ;;  %p386_p1 = scmp.lt.s32.totalorder %s31_s16, %s31_s16 }
   0x6   :  { %p382_p0 = scmp.ne.s32.totalorder %s31_s16, %s381_s19  ;;  %p387_p2 = scmp.lt.s32.totalorder %s381_s19, %s381_s19 }
   0x8   :  { %p388_p3 = por %p387_p2, %p386_p1 }
   0xa   :  { %p389_p4 = pnand %p388_p3, %p382_p0 }
   0xc   :  { %392 = shalt.err (!%p389_p4)
}
   0xd   :  { %s483_s20 = smov 128   ;;  %s484_s21 = smov 8  }
   0xe   :  { %36 = dma.hbm_to_vmem [thread:$0]  %s543_s1, 512, %s31_s16, [#allocation6], %s483_s20, %s483_s20, %s484_s21  }
   0xf   :  { %s401_s24 = scalar_lea.vmem %s19_s18, 256  ;;  %p406_p6 = scmp.lt.s32.totalorder %s19_s18, %s19_s18 }
  0x10   :  { %p402_p5 = scmp.ne.s32.totalorder %s19_s18, %s401_s24  ;;  %p407_p7 = scmp.lt.s32.totalorder %s401_s24, %s401_s24 }
  0x12   :  { %p408_p8 = por %p407_p7, %p406_p6 }
  0x14   :  { %p409_p9 = pnand %p408_p8, %p402_p5 }
  0x16   :  { %412 = shalt.err (!%p409_p9)
}
  0x17   :  { %24 = dma.hbm_to_vmem [thread:$0]  %s542_s0, 256, %s19_s18, [#allocation3], %s483_s20, %s483_s20, %s484_s21  }
  0x18   :  { %s485_s27 = smov [#allocation7]   ;;  %s486_s29 = smov [#allocation8]  }
  0x19   :  { %s42_s28 = sshll.u32 %s485_s27, 4  ;;  %s55_s30 = sshll.u32 %s486_s29, 4  ;;  %s43_s28 = int_to_ptr.vmem [resolvable:$true] %s42_s28  ;;  %s56_s30 = int_to_ptr.vmem [resolvable:$true] %s55_s30 }
  0x1a   :  { %s421_s1 = scalar_lea.vmem %s43_s28, 2048  ;;  %p426_p11 = scmp.lt.s32.totalorder %s43_s28, %s43_s28 }
  0x1b   :  { %p422_p10 = scmp.ne.s32.totalorder %s43_s28, %s421_s1  ;;  %p427_p12 = scmp.lt.s32.totalorder %s421_s1, %s421_s1 }
  0x1d   :  { %p428_p13 = por %p427_p12, %p426_p11 }
  0x1f   :  { %p429_p0 = pnand %p428_p13, %p422_p10 }
  0x21   :  { %432 = shalt.err (!%p429_p0)
}
  0x22   :  { %48 = dma.hbm_to_vmem [thread:$0]  %s544_s2, 2048, %s43_s28, [#allocation6], %s483_s20, %s483_s20, %s484_s21  }
  0x23   :  { %s441_s0 = scalar_lea.vmem %s56_s30, 128  ;;  %p446_p2 = scmp.lt.s32.totalorder %s56_s30, %s56_s30 }
  0x24   :  { %p442_p1 = scmp.ne.s32.totalorder %s56_s30, %s441_s0  ;;  %p447_p3 = scmp.lt.s32.totalorder %s441_s0, %s441_s0 }
  0x26   :  { %p448_p4 = por %p447_p3, %p446_p2 }
  0x28   :  { %p449_p5 = pnand %p448_p4, %p442_p1 }
  0x2a   :  { %452 = shalt.err (!%p449_p5)
}
  0x2b   :  { %58 = dma.hbm_to_vmem [thread:$0]  %s545_s3, 128, %s56_s30, [#allocation9]  }
  0x2c   :  { %473 = dma.done.wait [#allocation3], 256  }
  0x2d   :  { %474 = vsyncadd [#allocation3], 4294967040 }
  0x2e   :  { %475 = dma.done.wait [#allocation6], 2560  }
  0x2f   :  { %476 = vsyncadd [#allocation6], 4294964736 }
  0x30   :  { %477 = dma.done.wait [#allocation9], 128  }
  0x31   :  { %478 = vsyncadd [#allocation9], 4294967168  ;;  %vm82_vm0 = vcmask 261120   ;;  %v77_v0 = vld [vmem:[#allocation5 + $0x18] sm:$0xff]  ;;  %v76_v1 = vld [vmem:[#allocation5 + $0x10] sm:$0xff]  ;;  %v78_v22 = vlaneseq  ;;  %s487_s2 = smov [#allocation10]  }
  0x32   :  { %320 = vmatprep.subr.mxu0 %v77_v0  ;;  %v72_v2 = vld [vmem:[#allocation2] sm:$0xff]  ;;  %v75_v3 = vld [vmem:[#allocation5 + $0x8] sm:$0xff]  ;;  %v181_v4 = vld [vmem:[#allocation7 + $0x78] sm:$0xff]  ;;  %s280_s3 = sshll.u32 %s487_s2, 4  ;;  %s281_s3 = int_to_ptr.vmem [resolvable:$true] %s280_s3 }
  0x33   :  { %321 = vmatpush3.msra.mxu0 %v77_v0  ;;  %328 = vmatprep.mubr.msk.f32.mxu0 %vm82_vm0, %v72_v2  ;;  %v180_v5 = vld [vmem:[#allocation7 + $0x70] sm:$0xff]  ;;  %v74_v6 = vld [vmem:[#allocation5] sm:$0xff]  ;;  %v179_v7 = vld [vmem:[#allocation7 + $0x68] sm:$0xff]  ;;  %v79_v23 = vshrl.u32 %v78_v22, 7  ;;  %s453_s9 = scalar_lea.vmem %s281_s3, 256  ;;  %p458_p7 = scmp.lt.s32.totalorder %s281_s3, %s281_s3 }
  0x34   :  { %322 = vmatprep.subr.mxu0 %v76_v1  ;;  %331 = vmatprep.subr.mxu1 %v181_v4  ;;  %v73_v8 = vld [vmem:[#allocation2 + $0x8] sm:$0xff]  ;;  %v178_v9 = vld [vmem:[#allocation7 + $0x60] sm:$0xff]  ;;  %v176_v11 = vld [vmem:[#allocation7 + $0x50] sm:$0xff]  ;;  %p454_p6 = scmp.ne.s32.totalorder %s281_s3, %s453_s9  ;;  %p459_p8 = scmp.lt.s32.totalorder %s453_s9, %s453_s9 }
  0x35   :  { %323 = vmatpush3.msra.mxu0 %v76_v1  ;;  %332 = vmatpush3.msra.mxu1 %v181_v4  ;;  %v177_v10 = vld [vmem:[#allocation7 + $0x58] sm:$0xff]  ;;  %v175_v12 = vld [vmem:[#allocation7 + $0x48] sm:$0xff]  ;;  %v174_v13 = vld [vmem:[#allocation7 + $0x40] sm:$0xff]  ;;  %v80_v24 = vsub.s32 0, %v79_v23  ;;  %v184_v33 = vsub.s32 1, %v79_v23  ;;  %v265_v36 = vsub.s32 2, %v79_v23 }
  0x36   :  { %324 = vmatprep.subr.mxu0 %v75_v3  ;;  %333 = vmatprep.subr.mxu1 %v180_v5  ;;  %v173_v14 = vld [vmem:[#allocation7 + $0x38] sm:$0xff]  ;;  %v172_v15 = vld [vmem:[#allocation7 + $0x30] sm:$0xff]  ;;  %v171_v16 = vld [vmem:[#allocation7 + $0x28] sm:$0xff]  ;;  %p460_p9 = por %p459_p8, %p458_p7 }
  0x37   :  { %325 = vmatpush3.msra.mxu0 %v75_v3  ;;  %334 = vmatpush3.msra.mxu1 %v180_v5  ;;  %v170_v17 = vld [vmem:[#allocation7 + $0x20] sm:$0xff]  ;;  %v169_v18 = vld [vmem:[#allocation7 + $0x18] sm:$0xff]  ;;  %v168_v19 = vld [vmem:[#allocation7 + $0x10] sm:$0xff] }
  0x38   :  { %326 = vmatprep.subr.mxu0 %v74_v6  ;;  %335 = vmatprep.subr.mxu1 %v179_v7  ;;  %v167_v20 = vld [vmem:[#allocation7 + $0x8] sm:$0xff]  ;;  %v166_v21 = vld [vmem:[#allocation7] sm:$0xff]  ;;  %p461_p10 = pnand %p460_p9, %p454_p6 }
  0x39   :  { %327 = vmatpush3.msra.mxu0 %v74_v6  ;;  %336 = vmatpush3.msra.mxu1 %v179_v7  ;;  %v71_v25 = vld [vmem:[#allocation8] sm:$0xff] }
  0x3a   :  { %329 = vmatmul.mubr.msk.f32.vlgmr.msra.gmra.mxu0 %vm82_vm0, %v73_v8  ;;  %337 = vmatprep.subr.mxu1 %v178_v9  ;;  %v81_v26 = vrot.slane %v71_v25, %v80_v24  ;;  %v185_v34 = vrot.slane %v71_v25, %v184_v33  ;;  %v266_v41 = vrot.slane %v71_v25, %v265_v36 }
  0x3b   :  { %338 = vmatpush3.msra.mxu1 %v178_v9 }
  0x3c   :  { %339 = vmatprep.subr.mxu1 %v177_v10 }
  0x3d   :  { %340 = vmatpush3.msra.mxu1 %v177_v10 }
  0x3e   :  { %341 = vmatprep.subr.mxu1 %v176_v11 }
  0x3f   :  { %342 = vmatpush3.msra.mxu1 %v176_v11 }
  0x40   :  { %343 = vmatprep.subr.mxu1 %v175_v12 }
  0x41   :  { %344 = vmatpush3.msra.mxu1 %v175_v12 }
  0x42   :  { %345 = vmatprep.subr.mxu1 %v174_v13 }
  0x43   :  { %346 = vmatpush3.msra.mxu1 %v174_v13 }
  0x44   :  { %347 = vmatprep.subr.mxu1 %v173_v14 }
  0x45   :  { %348 = vmatpush3.msra.mxu1 %v173_v14 }
  0x46   :  { %349 = vmatprep.subr.mxu1 %v172_v15 }
  0x47   :  { %350 = vmatpush3.msra.mxu1 %v172_v15 }
  0x48   :  { %351 = vmatprep.subr.mxu1 %v171_v16 }
  0x49   :  { %352 = vmatpush3.msra.mxu1 %v171_v16 }
  0x4a   :  { %353 = vmatprep.subr.mxu1 %v170_v17 }
  0x4b   :  { %354 = vmatpush3.msra.mxu1 %v170_v17 }
  0x4c   :  { %355 = vmatprep.subr.mxu1 %v169_v18 }
  0x4d   :  { %356 = vmatpush3.msra.mxu1 %v169_v18 }
  0x4e   :  { %357 = vmatprep.subr.mxu1 %v168_v19 }
  0x4f   :  { %358 = vmatpush3.msra.mxu1 %v168_v19 }
  0x50   :  { %359 = vmatprep.subr.mxu1 %v167_v20 }
  0x51   :  { %360 = vmatpush3.msra.mxu1 %v167_v20 }
  0x52   :  { %361 = vmatprep.subr.mxu1 %v166_v21 }
  0x53   :  { %362 = vmatpush3.msra.mxu1 %v166_v21 }
  0xfa   :  { %v330_v27 = vpop.f32.mrf.mxu0 }
  0xfb   :  { %v161_v28 = vadd.f32 %v330_v27, %v81_v26 }
  0xfc   :  { %v155_v29 = vpop.f32.mrf.mxu0 }
  0xfd   :  { %v156_v30 = vadd.f32 %v155_v29, %v81_v26  ;;  %v165_v32 = vmax.f32 %v161_v28, 0.0 }
  0xff   :  { %v164_v31 = vmax.f32 %v156_v30, 0.0 }
 0x101   :  { %363 = vmatprep.mubr.f32.mxu1 %v164_v31 }
 0x102   :  { %364 = vmatmul.mubr.f32.vlgmr.msra.gmra.mxu1 %v165_v32 }
 0x1c2   :  { %v365_v35 = vpop.f32.mrf.mxu1 }
 0x1c3   :  { %v258_v38 = vadd.f32 %v365_v35, %v185_v34 }
 0x1c4   :  { %v252_v37 = vpop.f32.mrf.mxu1 }
 0x1c5   :  { %v253_v39 = vadd.f32 %v252_v37, %v185_v34  ;;  %v262_v42 = vmax.f32 %v258_v38, 0.0 }
 0x1c7   :  { %v261_v40 = vmax.f32 %v253_v39, 0.0  ;;  %v268_v44 = vmul.f32 %v266_v41, %v262_v42 }
 0x1c9   :  { %v267_v43 = vmul.f32 %v266_v41, %v261_v40 }
 0x1cb   :  { %269 = vadd.xlane.f32.xlu0 %v267_v43 }
 0x1cf   :  { %271 = vadd.xlane.f32.xlu0 %v268_v44 }
 0x254   :  { %v270_v45 = vpop.xlane.xlu0 %269 }
 0x255   :  { %273 = vst [vmem:[#allocation10] sm:$0xff] %v270_v45 }
 0x258   :  { %v272_v46 = vpop.xlane.xlu0 %271 }
 0x259   :  { %274 = vst [vmem:[#allocation10 + $0x8] sm:$0xff] %v272_v46 }
 0x25a   :  { %464 = shalt.err (!%p461_p10)
}
 0x25b   :  { %286 = dma.vmem_to_hbm [thread:$0]  %s281_s3, 256, %s546_s4, [#allocation4], %s483_s20, %s483_s20, %s484_s21  }
 0x25c   :  { %479 = dma.done.wait [#allocation4], 256  }
 0x25d   :  { %480 = vsyncadd [#allocation4], 4294967040 }
 0x25e   :  { %290 = vsyncpa [#allocation3], 1 }
 0x25f   :  { %291 = vsyncpa [#allocation6], 1 }
 0x260   :  { %292 = vsyncpa [#allocation9], 1 }
 0x261   :  { %293 = vsyncpa [#allocation4], 1 }

</bundles_post_ra>
